<compile_context>
chip_gen: v6e
topology: v6e:2x2x1
jax: 0.10.0
libtpu: 0.0.40
codegen_flags: <defaults>
</compile_context>

<pallas_src>
import jax
import jax.numpy as jnp
from jax import lax
from jax.experimental import pallas as pl
from jax.experimental.pallas import tpu as pltpu  # noqa: F401  (TPU backend)

BN_EPS = 1e-5


def encoder_head_kernel(x_ref, wt_ref, gb_ref, o_ref):
    """x:(B,K) f32, wt:(K,E) bf16, gb:(2,E) f32 [gamma;beta] -> o:(B,E) = BN(x @ wt)."""
    # bf16 MXU operands, f32 accumulation.
    x = x_ref[...].astype(jnp.bfloat16)
    y = jnp.dot(x, wt_ref[...], preferred_element_type=jnp.float32)   # (B, E) f32

    # BatchNorm1d, training mode: biased batch statistics over the batch axis.
    # One pass: the two reductions (sum, sum of squares) are independent.
    inv_b = 1.0 / y.shape[0]
    mean = jnp.sum(y, axis=0, keepdims=True) * inv_b                  # (1, E)
    mean_sq = jnp.sum(y * y, axis=0, keepdims=True) * inv_b           # (1, E)
    var = jnp.maximum(mean_sq - mean * mean, 0.0)                     # (1, E)

    gamma = gb_ref[0:1, :]
    beta = gb_ref[1:2, :]
    scale = gamma * lax.rsqrt(var + BN_EPS)                           # (1, E)
    shift = beta - mean * scale                                       # (1, E)
    o_ref[...] = (y * scale + shift).astype(o_ref.dtype)


def init_encoder_head_params(w, b, gamma, beta):
    """One-time (module-init) parameter preparation.

    w: (E, K) PyTorch-layout linear weight.  Returns cached kernel params:
      wt : (K, E) bf16   pre-transposed frozen weight
      gb : (2, E) f32    [gamma; beta] packed into a single buffer
    The linear bias is dropped: training-mode BatchNorm's mean subtraction
    cancels any per-feature constant exactly (and it does not affect variance).
    """
    del b  # mathematically a no-op under training-mode BN
    wt = jnp.transpose(w).astype(jnp.bfloat16)                        # (K, E), done once
    gb = jnp.stack(
        [gamma.astype(jnp.float32), beta.astype(jnp.float32)], axis=0  # (2, E)
    )
    return wt, gb


def encoder_cnn_head(features_nchw, wt, gb):
    """features_nchw: (B, C, 1, 1) resnet output.  wt/gb from init_encoder_head_params."""
    B = features_nchw.shape[0]
    x = features_nchw.reshape(B, -1)                                  # features.reshape(B, -1)
    K, E = wt.shape

    return pl.pallas_call(
        encoder_head_kernel,
        out_shape=jax.ShapeDtypeStruct((B, E), jnp.float32),
        in_specs=[
            pl.BlockSpec((B, K), lambda: (0, 0)),
            pl.BlockSpec((K, E), lambda: (0, 0)),
            pl.BlockSpec((2, E), lambda: (0, 0)),
        ],
        out_specs=pl.BlockSpec((B, E), lambda: (0, 0)),
    )(x, wt, gb)


def reference_head(features_nchw, w, b, gamma, beta):
    """PyTorch semantics (Linear with bias + training-mode BN), using the same
    bf16-stored-weight / f32-accumulate precision policy as the kernel."""
    B = features_nchw.shape[0]
    x = features_nchw.reshape(B, -1).astype(jnp.bfloat16)
    wt = jnp.transpose(w).astype(jnp.bfloat16)
    y = jnp.dot(x, wt, preferred_element_type=jnp.float32) + b.astype(jnp.float32)
    mean = jnp.mean(y, axis=0, keepdims=True)
    var = jnp.mean((y - mean) ** 2, axis=0, keepdims=True)
    return gamma * (y - mean) / jnp.sqrt(var + BN_EPS) + beta


if __name__ == "__main__":
    B = 8                       # batch
    K = 2048                    # resnet50 fc.in_features
    E = 128                     # embed_size

    key = jax.random.PRNGKey(0)
    k_feat, k_w, k_b, k_g, k_beta = jax.random.split(key, 5)

    # Output of the (untranslated) frozen resnet50 backbone: (B, 2048, 1, 1).
    features = jax.random.normal(k_feat, (B, K, 1, 1), dtype=jnp.float32)

    # Deterministic parameter init (shapes from nn.Linear(2048, E) / nn.BatchNorm1d(E)).
    w = jax.random.normal(k_w, (E, K), dtype=jnp.float32) / jnp.sqrt(K)
    b = jax.random.normal(k_b, (E,), dtype=jnp.float32) * 0.01
    gamma = 1.0 + 0.1 * jax.random.normal(k_g, (E,), dtype=jnp.float32)
    beta = 0.1 * jax.random.normal(k_beta, (E,), dtype=jnp.float32)

    # One-time module-init parameter prep (hoisted out of the per-call path).
    wt, gb = init_encoder_head_params(w, b, gamma, beta)
    wt, gb = jax.block_until_ready((wt, gb))

    out = encoder_cnn_head(features, wt, gb)
    out = jax.block_until_ready(out)

    ref = reference_head(features, w, b, gamma, beta)
    assert out.shape == (B, E)
    assert jnp.allclose(out, ref, atol=5e-4, rtol=5e-4), "mismatch vs reference"

    print("KERNEL_OK")
</pallas_src>

<mosaic_0001>
module attributes {stable_mosaic.version = 11 : i64} {
  func.func @encoder_head_kernel(%arg0: memref<8x2048xf32, #tpu.memory_space<vmem>>, %arg1: memref<2048x128xbf16, #tpu.memory_space<vmem>>, %arg2: memref<2x128xf32, #tpu.memory_space<vmem>>, %arg3: memref<8x128xf32, #tpu.memory_space<vmem>>) attributes {dimension_semantics = [], scalar_prefetch = 0 : i64, scratch_operands = 0 : i64, tpu.core_type = #tpu.core_type<tc>} {
    %c0 = arith.constant 0 : index
    %c0_0 = arith.constant 0 : index
    %0 = vector.load %arg0[%c0, %c0_0] : memref<8x2048xf32, #tpu.memory_space<vmem>>, vector<8x2048xf32>
    %1 = arith.truncf %0 : vector<8x2048xf32> to vector<8x2048xbf16>
    %c0_1 = arith.constant 0 : index
    %c0_2 = arith.constant 0 : index
    %2 = vector.load %arg1[%c0_1, %c0_2] : memref<2048x128xbf16, #tpu.memory_space<vmem>>, vector<2048x128xbf16>
    %cst = arith.constant dense<0.000000e+00> : vector<8x128xf32>
    %3 = tpu.matmul %1, %2, %cst {dimension_numbers = #tpu.dot_dimension_numbers<[1], [0], [0], [1], [0, 0, 1, 1], [], []>} : vector<8x2048xbf16>, vector<2048x128xbf16>, vector<8x128xf32> -> vector<8x128xf32>
    %cst_3 = arith.constant dense<0.000000e+00> : vector<128xf32>
    %4 = vector.multi_reduction <add>, %3, %cst_3 [0] : vector<8x128xf32> to vector<128xf32>
    %5 = vector.shape_cast %4 : vector<128xf32> to vector<1x128xf32>
    %cst_4 = arith.constant 1.250000e-01 : f32
    %6 = vector.broadcast %cst_4 : f32 to vector<1x128xf32>
    %7 = arith.mulf %5, %6 : vector<1x128xf32>
    %8 = arith.mulf %3, %3 : vector<8x128xf32>
    %cst_5 = arith.constant dense<0.000000e+00> : vector<128xf32>
    %9 = vector.multi_reduction <add>, %8, %cst_5 [0] : vector<8x128xf32> to vector<128xf32>
    %10 = vector.shape_cast %9 : vector<128xf32> to vector<1x128xf32>
    %cst_6 = arith.constant 1.250000e-01 : f32
    %11 = vector.broadcast %cst_6 : f32 to vector<1x128xf32>
    %12 = arith.mulf %10, %11 : vector<1x128xf32>
    %13 = arith.mulf %7, %7 : vector<1x128xf32>
    %14 = arith.subf %12, %13 : vector<1x128xf32>
    %cst_7 = arith.constant 0.000000e+00 : f32
    %15 = vector.broadcast %cst_7 : f32 to vector<1x128xf32>
    %16 = arith.maximumf %14, %15 : vector<1x128xf32>
    %c0_8 = arith.constant 0 : index
    %c0_9 = arith.constant 0 : index
    %17 = vector.load %arg2[%c0_8, %c0_9] : memref<2x128xf32, #tpu.memory_space<vmem>>, vector<1x128xf32>
    %c1 = arith.constant 1 : index
    %c0_10 = arith.constant 0 : index
    %18 = vector.load %arg2[%c1, %c0_10] : memref<2x128xf32, #tpu.memory_space<vmem>>, vector<1x128xf32>
    %cst_11 = arith.constant 9.99999974E-6 : f32
    %19 = vector.broadcast %cst_11 : f32 to vector<1x128xf32>
    %20 = arith.addf %16, %19 : vector<1x128xf32>
    %21 = math.rsqrt %20 : vector<1x128xf32>
    %22 = arith.mulf %17, %21 : vector<1x128xf32>
    %23 = arith.mulf %7, %22 : vector<1x128xf32>
    %24 = arith.subf %18, %23 : vector<1x128xf32>
    %25 = vector.broadcast %22 : vector<1x128xf32> to vector<8x128xf32>
    %26 = arith.mulf %3, %25 : vector<8x128xf32>
    %27 = vector.broadcast %24 : vector<1x128xf32> to vector<8x128xf32>
    %28 = arith.addf %26, %27 : vector<8x128xf32>
    %c0_12 = arith.constant 0 : index
    %c0_13 = arith.constant 0 : index
    %29 = vector.load %arg3[%c0_12, %c0_13] : memref<8x128xf32, #tpu.memory_space<vmem>>, vector<8x128xf32>
    tpu.vector_store %arg3[%c0_12, %c0_13], %28 {strides = array<i32>} : memref<8x128xf32, #tpu.memory_space<vmem>>, vector<8x128xf32>,
    return
  }
}

</mosaic_0001>

<bundles_post_ra>
// kernel: tpu_custom_call.1
= control target key start
LH: loop header
LB: loop body
LE: loop exit
PB: predicated region body
PF: predicated region fallthrough
CT: control target
= control target key end

     0   :  { %8 = vsyncpa [#allocation3], 0  ;;  %s2015_s0 = inlined_call_operand.hbm [shape: f32[8,2048], index: 0, kind: input, shape index: {}]   ;;  %s2016_s1 = inlined_call_operand.hbm [shape: bf16[2048,128], index: 1, kind: input, shape index: {}]   ;;  %s2017_s2 = inlined_call_operand.vmem [shape: f32[2,128], index: 2, kind: input, shape index: {}]   ;;  %s2018_s3 = inlined_call_operand.hbm [shape: f32[8,128], index: 3, kind: output, shape index: {}]  }
   0x1   :  { %9 = vsyncpa [#allocation6], 0 }
   0x2   :  { %10 = vsyncpa [#allocation4], 0  ;;  %s1975_s12 = smov [#allocation2]   ;;  %s1976_s14 = smov [#allocation5]  }
   0x3   :  { %s17_s13 = sshll.u32 %s1975_s12, 4  ;;  %s26_s15 = sshll.u32 %s1976_s14, 4  ;;  %s18_s13 = int_to_ptr.vmem [resolvable:$true] %s17_s13  ;;  %s27_s15 = int_to_ptr.vmem [resolvable:$true] %s26_s15 }
   0x4   :  { %s1917_s16 = scalar_lea.vmem %s18_s13, 2048  ;;  %p1922_p1 = scmp.lt.s32.totalorder %s18_s13, %s18_s13 }
   0x5   :  { %p1918_p0 = scmp.ne.s32.totalorder %s18_s13, %s1917_s16  ;;  %p1923_p2 = scmp.lt.s32.totalorder %s1917_s16, %s1917_s16 }
   0x7   :  { %p1924_p3 = por %p1923_p2, %p1922_p1 }
   0x9   :  { %p1925_p4 = pnand %p1924_p3, %p1918_p0 }
   0xb   :  { %1928 = shalt.err (!%p1925_p4)
}
   0xc   :  { %20 = dma.hbm_to_vmem [thread:$0]  %s2015_s0, 2048, %s18_s13, [#allocation3]  }
   0xd   :  { %s1937_s19 = scalar_lea.vmem %s27_s15, 16384  ;;  %p1942_p6 = scmp.lt.s32.totalorder %s27_s15, %s27_s15 }
   0xe   :  { %p1938_p5 = scmp.ne.s32.totalorder %s27_s15, %s1937_s19  ;;  %p1943_p7 = scmp.lt.s32.totalorder %s1937_s19, %s1937_s19 }
  0x10   :  { %p1944_p8 = por %p1943_p7, %p1942_p6 }
  0x12   :  { %p1945_p9 = pnand %p1944_p8, %p1938_p5 }
  0x14   :  { %1948 = shalt.err (!%p1945_p9)
}
  0x15   :  { %s1977_s20 = smov 64   ;;  %s1978_s21 = smov 4  }
  0x16   :  { %32 = dma.hbm_to_vmem [thread:$0]  %s2016_s1, 16384, %s27_s15, [#allocation6], %s1977_s20, %s1977_s20, %s1978_s21  }
  0x17   :  { %1969 = dma.done.wait [#allocation3], 2048  }
  0x18   :  { %1970 = vsyncadd [#allocation3], 4294965248 }
  0x19   :  { %1971 = dma.done.wait [#allocation6], 16384  }
  0x1a   :  { %1972 = vsyncadd [#allocation6], 4294950912  ;;  %v1779_v0 = vld [vmem:[#allocation5 + $0x78] sm:$0xff]   ;;  %v1783_v4 = vld [vmem:[#allocation5 + $0x70] sm:$0xff]   ;;  %s1979_s26 = smov [#allocation7]  }
  0x1b   :  { %v1780_v1 = vld [vmem:[#allocation5 + $0xf8] sm:$0xff]   ;;  %1598 = vmatprep.subr.bf16.mxu0 %v1779_v0  ;;  %v1784_v5 = vld [vmem:[#allocation5 + $0xf0] sm:$0xff]   ;;  %v1787_v8 = vld [vmem:[#allocation5 + $0x68] sm:$0xff]   ;;  %s1460_s27 = sshll.u32 %s1979_s26, 4  ;;  %s1461_s27 = int_to_ptr.vmem [resolvable:$true] %s1460_s27 }
  0x1c   :  { %v1781_v2 = vld [vmem:[#allocation5 + $0x38] sm:$0xff]   ;;  %1620 = vmatprep.subr.bf16.mxu1 %v1780_v1  ;;  %v1785_v6 = vld [vmem:[#allocation5 + $0x30] sm:$0xff]   ;;  %v1788_v9 = vld [vmem:[#allocation5 + $0xe8] sm:$0xff]   ;;  %s1949_s28 = scalar_lea.vmem %s1461_s27, 128  ;;  %p1954_p11 = scmp.lt.s32.totalorder %s1461_s27, %s1461_s27 }
  0x1d   :  { %v1782_v3 = vld [vmem:[#allocation5 + $0xb8] sm:$0xff]   ;;  %1599 = vmatpush3.bf16.msra.mxu0 %v1781_v2  ;;  %v1786_v7 = vld [vmem:[#allocation5 + $0xb0] sm:$0xff]   ;;  %v1789_v10 = vld [vmem:[#allocation5 + $0x28] sm:$0xff]   ;;  %p1950_p10 = scmp.ne.s32.totalorder %s1461_s27, %s1949_s28  ;;  %p1955_p12 = scmp.lt.s32.totalorder %s1949_s28, %s1949_s28 }
  0x1e   :  { %1621 = vmatpush3.bf16.msra.mxu1 %v1782_v3  ;;  %1600 = vmatprep.subr.bf16.mxu0 %v1783_v4  ;;  %v1790_v11 = vld [vmem:[#allocation5 + $0xa8] sm:$0xff]   ;;  %v1791_v12 = vld [vmem:[#allocation5 + $0x60] sm:$0xff]   ;;  %v1795_v16 = vld [vmem:[#allocation5 + $0x58] sm:$0xff]  }
  0x1f   :  { %1622 = vmatprep.subr.bf16.mxu1 %v1784_v5  ;;  %v1792_v13 = vld [vmem:[#allocation5 + $0xe0] sm:$0xff]   ;;  %v1796_v17 = vld [vmem:[#allocation5 + $0xd8] sm:$0xff]   ;;  %v1799_v20 = vld [vmem:[#allocation5 + $0x50] sm:$0xff]   ;;  %p1956_p13 = por %p1955_p12, %p1954_p11 }
  0x20   :  { %v1793_v14 = vld [vmem:[#allocation5 + $0x20] sm:$0xff]   ;;  %v1797_v18 = vld [vmem:[#allocation5 + $0x18] sm:$0xff]   ;;  %v1800_v21 = vld [vmem:[#allocation5 + $0xd0] sm:$0xff]  }
  0x21   :  { %1601 = vmatpush3.bf16.msra.mxu0 %v1785_v6  ;;  %v1794_v15 = vld [vmem:[#allocation5 + $0xa0] sm:$0xff]   ;;  %v1798_v19 = vld [vmem:[#allocation5 + $0x98] sm:$0xff]   ;;  %v1801_v22 = vld [vmem:[#allocation5 + $0x10] sm:$0xff]   ;;  %p1957_p0 = pnand %p1956_p13, %p1950_p10 }
  0x22   :  { %1623 = vmatpush3.bf16.msra.mxu1 %v1786_v7  ;;  %1602 = vmatprep.subr.bf16.mxu0 %v1787_v8  ;;  %v1802_v23 = vld [vmem:[#allocation5 + $0x90] sm:$0xff]   ;;  %v1803_v24 = vld [vmem:[#allocation5 + $0x48] sm:$0xff]   ;;  %v1807_v28 = vld [vmem:[#allocation5 + $0x40] sm:$0xff]  }
  0x23   :  { %1624 = vmatprep.subr.bf16.mxu1 %v1788_v9  ;;  %v1804_v25 = vld [vmem:[#allocation5 + $0xc8] sm:$0xff]   ;;  %v1808_v29 = vld [vmem:[#allocation5 + $0xc0] sm:$0xff]   ;;  %v45_v33 = vld [vmem:[#allocation2 + $0x18] sm:$0xff] }
  0x24   :  { %v1805_v26 = vld [vmem:[#allocation5 + $0x8] sm:$0xff]   ;;  %v1809_v30 = vld [vmem:[#allocation5] sm:$0xff]   ;;  %v61_v36 = vpack.c.bf16 %v45_v33, %v45_v33  ;;  %v44_v38 = vld [vmem:[#allocation2 + $0x10] sm:$0xff] }
  0x25   :  { %1603 = vmatpush3.bf16.msra.mxu0 %v1789_v10  ;;  %v1806_v27 = vld [vmem:[#allocation5 + $0x88] sm:$0xff]   ;;  %v1810_v31 = vld [vmem:[#allocation5 + $0x80] sm:$0xff]   ;;  %v60_v39 = vpack.c.bf16 %v44_v38, %v44_v38  ;;  %v1811_v40 = vld [vmem:[#allocation5 + $0x178] sm:$0xff]  }
  0x26   :  { %1625 = vmatpush3.bf16.msra.mxu1 %v1790_v11  ;;  %1604 = vmatprep.subr.bf16.mxu0 %v1791_v12  ;;  %v43_v32 = vld [vmem:[#allocation2 + $0x8] sm:$0xff]  ;;  %v42_v34 = vld [vmem:[#allocation2] sm:$0xff]  ;;  %v1812_v41 = vld [vmem:[#allocation5 + $0x1f8] sm:$0xff]  }
  0x27   :  { %1626 = vmatprep.subr.bf16.mxu1 %v1792_v13  ;;  %v59_v35 = vpack.c.bf16 %v43_v32, %v43_v32  ;;  %v58_v37 = vpack.c.bf16 %v42_v34, %v42_v34  ;;  %1170 = vmatprep.mubr.bf16.mxu1 %v61_v36  ;;  %v1813_v42 = vld [vmem:[#allocation5 + $0x138] sm:$0xff]   ;;  %v1815_v44 = vld [vmem:[#allocation5 + $0x170] sm:$0xff]   ;;  %v1819_v48 = vld [vmem:[#allocation5 + $0x168] sm:$0xff]  }
  0x28   :  { %v1814_v43 = vld [vmem:[#allocation5 + $0x1b8] sm:$0xff]   ;;  %v1816_v45 = vld [vmem:[#allocation5 + $0x1f0] sm:$0xff]   ;;  %v1820_v49 = vld [vmem:[#allocation5 + $0x1e8] sm:$0xff]  }
  0x29   :  { %1605 = vmatpush3.bf16.msra.mxu0 %v1793_v14  ;;  %1130 = vmatprep.mubr.bf16.mxu0 %v59_v35  ;;  %v1817_v46 = vld [vmem:[#allocation5 + $0x130] sm:$0xff]   ;;  %v1821_v50 = vld [vmem:[#allocation5 + $0x128] sm:$0xff]   ;;  %v1823_v52 = vld [vmem:[#allocation5 + $0x160] sm:$0xff]  }
  0x2a   :  { %1627 = vmatpush3.bf16.msra.mxu1 %v1794_v15  ;;  %1606 = vmatprep.subr.bf16.mxu0 %v1795_v16  ;;  %v1818_v47 = vld [vmem:[#allocation5 + $0x1b0] sm:$0xff]   ;;  %v1822_v51 = vld [vmem:[#allocation5 + $0x1a8] sm:$0xff]   ;;  %v1824_v53 = vld [vmem:[#allocation5 + $0x1e0] sm:$0xff]  }
  0x2b   :  { %1628 = vmatprep.subr.bf16.mxu1 %v1796_v17  ;;  %v1825_v54 = vld [vmem:[#allocation5 + $0x120] sm:$0xff]   ;;  %v1827_v56 = vld [vmem:[#allocation5 + $0x158] sm:$0xff]   ;;  %v1831_v60 = vld [vmem:[#allocation5 + $0x150] sm:$0xff]  }
  0x2c   :  { %v1826_v55 = vld [vmem:[#allocation5 + $0x1a0] sm:$0xff]   ;;  %v1828_v57 = vld [vmem:[#allocation5 + $0x1d8] sm:$0xff]   ;;  %v1832_v61 = vld [vmem:[#allocation5 + $0x1d0] sm:$0xff]  }
  0x2d   :  { %1607 = vmatpush3.bf16.msra.mxu0 %v1797_v18  ;;  %v1829_v58 = vld [vmem:[#allocation5 + $0x118] sm:$0xff]   ;;  %v1833_v62 = vld [vmem:[#allocation5 + $0x110] sm:$0xff]   ;;  %v1835_v0 = vld [vmem:[#allocation5 + $0x148] sm:$0xff]  }
  0x2e   :  { %1629 = vmatpush3.bf16.msra.mxu1 %v1798_v19  ;;  %1608 = vmatprep.subr.bf16.mxu0 %v1799_v20  ;;  %v1830_v59 = vld [vmem:[#allocation5 + $0x198] sm:$0xff]   ;;  %v1834_v63 = vld [vmem:[#allocation5 + $0x190] sm:$0xff]   ;;  %v1836_v1 = vld [vmem:[#allocation5 + $0x1c8] sm:$0xff]  }
  0x2f   :  { %1630 = vmatprep.subr.bf16.mxu1 %v1800_v21  ;;  %v1837_v2 = vld [vmem:[#allocation5 + $0x108] sm:$0xff]   ;;  %v1839_v4 = vld [vmem:[#allocation5 + $0x140] sm:$0xff]   ;;  %v49_v9 = vld [vmem:[#allocation2 + $0x38] sm:$0xff] }
  0x30   :  { %v1838_v3 = vld [vmem:[#allocation5 + $0x188] sm:$0xff]   ;;  %v1840_v5 = vld [vmem:[#allocation5 + $0x1c0] sm:$0xff]   ;;  %v65_v11 = vpack.c.bf16 %v49_v9, %v49_v9  ;;  %v48_v13 = vld [vmem:[#allocation2 + $0x30] sm:$0xff] }
  0x31   :  { %1609 = vmatpush3.bf16.msra.mxu0 %v1801_v22  ;;  %v1841_v6 = vld [vmem:[#allocation5 + $0x100] sm:$0xff]   ;;  %v47_v8 = vld [vmem:[#allocation2 + $0x28] sm:$0xff]  ;;  %v64_v15 = vpack.c.bf16 %v48_v13, %v48_v13  ;;  %v1843_v16 = vld [vmem:[#allocation5 + $0x278] sm:$0xff]  }
  0x32   :  { %1631 = vmatpush3.bf16.msra.mxu1 %v1802_v23  ;;  %1610 = vmatprep.subr.bf16.mxu0 %v1803_v24  ;;  %v1842_v7 = vld [vmem:[#allocation5 + $0x180] sm:$0xff]   ;;  %v63_v10 = vpack.c.bf16 %v47_v8, %v47_v8  ;;  %v1844_v17 = vld [vmem:[#allocation5 + $0x2f8] sm:$0xff]   ;;  %v1847_v20 = vld [vmem:[#allocation5 + $0x270] sm:$0xff]  }
  0x33   :  { %1632 = vmatprep.subr.bf16.mxu1 %v1804_v25  ;;  %v46_v12 = vld [vmem:[#allocation2 + $0x20] sm:$0xff]  ;;  %v1845_v18 = vld [vmem:[#allocation5 + $0x238] sm:$0xff]   ;;  %v1848_v21 = vld [vmem:[#allocation5 + $0x2f0] sm:$0xff]  }
  0x34   :  { %v62_v14 = vpack.c.bf16 %v46_v12, %v46_v12  ;;  %v1846_v19 = vld [vmem:[#allocation5 + $0x2b8] sm:$0xff]   ;;  %v1849_v22 = vld [vmem:[#allocation5 + $0x230] sm:$0xff]   ;;  %v1851_v24 = vld [vmem:[#allocation5 + $0x268] sm:$0xff]  }
  0x35   :  { %1611 = vmatpush3.bf16.msra.mxu0 %v1805_v26  ;;  %v1850_v23 = vld [vmem:[#allocation5 + $0x2b0] sm:$0xff]   ;;  %v1852_v25 = vld [vmem:[#allocation5 + $0x2e8] sm:$0xff]   ;;  %v1859_v32 = vld [vmem:[#allocation5 + $0x258] sm:$0xff]  }
  0x36   :  { %1633 = vmatpush3.bf16.msra.mxu1 %v1806_v27  ;;  %1612 = vmatprep.subr.bf16.mxu0 %v1807_v28  ;;  %v1853_v26 = vld [vmem:[#allocation5 + $0x228] sm:$0xff]   ;;  %v1855_v28 = vld [vmem:[#allocation5 + $0x260] sm:$0xff]   ;;  %v1860_v33 = vld [vmem:[#allocation5 + $0x2d8] sm:$0xff]  }
  0x37   :  { %1634 = vmatprep.subr.bf16.mxu1 %v1808_v29  ;;  %v1854_v27 = vld [vmem:[#allocation5 + $0x2a8] sm:$0xff]   ;;  %v1856_v29 = vld [vmem:[#allocation5 + $0x2e0] sm:$0xff]   ;;  %v1861_v34 = vld [vmem:[#allocation5 + $0x218] sm:$0xff]  }
  0x38   :  { %v1862_v35 = vld [vmem:[#allocation5 + $0x298] sm:$0xff]   ;;  %v1863_v36 = vld [vmem:[#allocation5 + $0x250] sm:$0xff]  }
  0x39   :  { %1613 = vmatpush3.bf16.msra.mxu0 %v1809_v30  ;;  %v1857_v30 = vld [vmem:[#allocation5 + $0x220] sm:$0xff]   ;;  %v1865_v38 = vld [vmem:[#allocation5 + $0x210] sm:$0xff]   ;;  %v1891_v8 = vld [vmem:[#allocation5 + $0x358] sm:$0xff]  }
  0x3a   :  { %1635 = vmatpush3.bf16.msra.mxu1 %v1810_v31  ;;  %1642 = vmatprep.subr.bf16.mxu0 %v1811_v40  ;;  %v1858_v31 = vld [vmem:[#allocation5 + $0x2a0] sm:$0xff]   ;;  %v1867_v40 = vld [vmem:[#allocation5 + $0x248] sm:$0xff]   ;;  %v1892_v9 = vld [vmem:[#allocation5 + $0x3d8] sm:$0xff]  }
  0x3b   :  { %1664 = vmatprep.subr.bf16.mxu1 %v1812_v41  ;;  %v1868_v41 = vld [vmem:[#allocation5 + $0x2c8] sm:$0xff]   ;;  %v1895_v12 = vld [vmem:[#allocation5 + $0x350] sm:$0xff]  }
  0x3c   :  { %1131 = vmatmul.mubr.bf16.vlgmr.msra.gmra.mxu0 %v58_v37  ;;  %v1864_v37 = vld [vmem:[#allocation5 + $0x2d0] sm:$0xff]  }
  0x3d   :  { %1171 = vmatmul.mubr.bf16.vlgmr.msra.gmra.mxu1 %v60_v39  ;;  %1643 = vmatpush3.bf16.msra.mxu0 %v1813_v42  ;;  %v1866_v39 = vld [vmem:[#allocation5 + $0x290] sm:$0xff]   ;;  %v1869_v42 = vld [vmem:[#allocation5 + $0x208] sm:$0xff]  }
  0x3e   :  { %1665 = vmatpush3.bf16.msra.mxu1 %v1814_v43  ;;  %1644 = vmatprep.subr.bf16.mxu0 %v1815_v44  ;;  %v1870_v43 = vld [vmem:[#allocation5 + $0x288] sm:$0xff]   ;;  %v1871_v44 = vld [vmem:[#allocation5 + $0x240] sm:$0xff]   ;;  %v1896_v13 = vld [vmem:[#allocation5 + $0x3d0] sm:$0xff]  }
  0x3f   :  { %1666 = vmatprep.subr.bf16.mxu1 %v1816_v45  ;;  %1210 = vmatprep.mubr.bf16.mxu0 %v63_v10  ;;  %v1872_v45 = vld [vmem:[#allocation5 + $0x2c0] sm:$0xff]   ;;  %v1893_v10 = vld [vmem:[#allocation5 + $0x318] sm:$0xff]  }
  0x40   :  { %1250 = vmatprep.mubr.bf16.mxu1 %v65_v11  ;;  %v1894_v11 = vld [vmem:[#allocation5 + $0x398] sm:$0xff]  }
  0x41   :  { %1645 = vmatpush3.bf16.msra.mxu0 %v1817_v46  ;;  %v1873_v46 = vld [vmem:[#allocation5 + $0x200] sm:$0xff]  }
  0x42   :  { %1667 = vmatpush3.bf16.msra.mxu1 %v1818_v47  ;;  %1646 = vmatprep.subr.bf16.mxu0 %v1819_v48  ;;  %v1874_v47 = vld [vmem:[#allocation5 + $0x280] sm:$0xff]   ;;  %v51_v48 = vld [vmem:[#allocation2 + $0x48] sm:$0xff] }
  0x43   :  { %1668 = vmatprep.subr.bf16.mxu1 %v1820_v49  ;;  %v67_v49 = vpack.c.bf16 %v51_v48, %v51_v48 }
  0x45   :  { %1647 = vmatpush3.bf16.msra.mxu0 %v1821_v50  ;;  %v53_v50 = vld [vmem:[#allocation2 + $0x58] sm:$0xff] }
  0x46   :  { %1669 = vmatpush3.bf16.msra.mxu1 %v1822_v51  ;;  %1648 = vmatprep.subr.bf16.mxu0 %v1823_v52  ;;  %v50_v51 = vld [vmem:[#allocation2 + $0x40] sm:$0xff]  ;;  %v52_v52 = vld [vmem:[#allocation2 + $0x50] sm:$0xff] }
  0x47   :  { %1670 = vmatprep.subr.bf16.mxu1 %v1824_v53  ;;  %v69_v53 = vpack.c.bf16 %v53_v50, %v53_v50 }
  0x49   :  { %1649 = vmatpush3.bf16.msra.mxu0 %v1825_v54  ;;  %v66_v54 = vpack.c.bf16 %v50_v51, %v50_v51 }
  0x4a   :  { %1671 = vmatpush3.bf16.msra.mxu1 %v1826_v55  ;;  %1650 = vmatprep.subr.bf16.mxu0 %v1827_v56  ;;  %v68_v55 = vpack.c.bf16 %v52_v52, %v52_v52  ;;  %v1875_v56 = vld [vmem:[#allocation5 + $0x378] sm:$0xff]  }
  0x4b   :  { %1672 = vmatprep.subr.bf16.mxu1 %v1828_v57  ;;  %v1876_v57 = vld [vmem:[#allocation5 + $0x3f8] sm:$0xff]  }
  0x4d   :  { %1651 = vmatpush3.bf16.msra.mxu0 %v1829_v58  ;;  %v1877_v58 = vld [vmem:[#allocation5 + $0x338] sm:$0xff]  }
  0x4e   :  { %1673 = vmatpush3.bf16.msra.mxu1 %v1830_v59  ;;  %1652 = vmatprep.subr.bf16.mxu0 %v1831_v60  ;;  %v1878_v59 = vld [vmem:[#allocation5 + $0x3b8] sm:$0xff]   ;;  %v1879_v60 = vld [vmem:[#allocation5 + $0x370] sm:$0xff]  }
  0x4f   :  { %1674 = vmatprep.subr.bf16.mxu1 %v1832_v61  ;;  %v1880_v61 = vld [vmem:[#allocation5 + $0x3f0] sm:$0xff]  }
  0x51   :  { %1653 = vmatpush3.bf16.msra.mxu0 %v1833_v62  ;;  %v1881_v62 = vld [vmem:[#allocation5 + $0x330] sm:$0xff]  }
  0x52   :  { %1675 = vmatpush3.bf16.msra.mxu1 %v1834_v63  ;;  %1654 = vmatprep.subr.bf16.mxu0 %v1835_v0  ;;  %v1882_v63 = vld [vmem:[#allocation5 + $0x3b0] sm:$0xff]   ;;  %v1883_v0 = vld [vmem:[#allocation5 + $0x368] sm:$0xff]  }
  0x53   :  { %1676 = vmatprep.subr.bf16.mxu1 %v1836_v1  ;;  %v1884_v1 = vld [vmem:[#allocation5 + $0x3e8] sm:$0xff]  }
  0x55   :  { %1655 = vmatpush3.bf16.msra.mxu0 %v1837_v2  ;;  %v1885_v2 = vld [vmem:[#allocation5 + $0x328] sm:$0xff]  }
  0x56   :  { %1677 = vmatpush3.bf16.msra.mxu1 %v1838_v3  ;;  %1656 = vmatprep.subr.bf16.mxu0 %v1839_v4  ;;  %v1886_v3 = vld [vmem:[#allocation5 + $0x3a8] sm:$0xff]   ;;  %v1887_v4 = vld [vmem:[#allocation5 + $0x360] sm:$0xff]  }
  0x57   :  { %1678 = vmatprep.subr.bf16.mxu1 %v1840_v5  ;;  %v1888_v5 = vld [vmem:[#allocation5 + $0x3e0] sm:$0xff]  }
  0x59   :  { %1657 = vmatpush3.bf16.msra.mxu0 %v1841_v6  ;;  %v1889_v6 = vld [vmem:[#allocation5 + $0x320] sm:$0xff]  }
  0x5a   :  { %1679 = vmatpush3.bf16.msra.mxu1 %v1842_v7  ;;  %1686 = vmatprep.subr.bf16.mxu0 %v1843_v16  ;;  %v1890_v7 = vld [vmem:[#allocation5 + $0x3a0] sm:$0xff]   ;;  %v1899_v16 = vld [vmem:[#allocation5 + $0x348] sm:$0xff]  }
  0x5b   :  { %1708 = vmatprep.subr.bf16.mxu1 %v1844_v17  ;;  %v1900_v17 = vld [vmem:[#allocation5 + $0x3c8] sm:$0xff]  }
  0x5c   :  { %1211 = vmatmul.mubr.bf16.vlgmr.msra.gmra.mxu0 %v62_v14  ;;  %v1897_v14 = vld [vmem:[#allocation5 + $0x310] sm:$0xff]  }
  0x5d   :  { %1251 = vmatmul.mubr.bf16.vlgmr.msra.gmra.mxu1 %v64_v15  ;;  %1687 = vmatpush3.bf16.msra.mxu0 %v1845_v18  ;;  %v1898_v15 = vld [vmem:[#allocation5 + $0x390] sm:$0xff]   ;;  %v1901_v18 = vld [vmem:[#allocation5 + $0x308] sm:$0xff]  }
  0x5e   :  { %1709 = vmatpush3.bf16.msra.mxu1 %v1846_v19  ;;  %1688 = vmatprep.subr.bf16.mxu0 %v1847_v20  ;;  %v1902_v19 = vld [vmem:[#allocation5 + $0x388] sm:$0xff]   ;;  %v1903_v20 = vld [vmem:[#allocation5 + $0x340] sm:$0xff]  }
  0x5f   :  { %1710 = vmatprep.subr.bf16.mxu1 %v1848_v21  ;;  %1290 = vmatprep.mubr.bf16.mxu0 %v67_v49  ;;  %v1904_v21 = vld [vmem:[#allocation5 + $0x3c0] sm:$0xff]  }
  0x60   :  { %1330 = vmatprep.mubr.bf16.mxu1 %v69_v53 }
  0x61   :  { %1689 = vmatpush3.bf16.msra.mxu0 %v1849_v22  ;;  %v1905_v22 = vld [vmem:[#allocation5 + $0x300] sm:$0xff]  }
  0x62   :  { %1711 = vmatpush3.bf16.msra.mxu1 %v1850_v23  ;;  %1690 = vmatprep.subr.bf16.mxu0 %v1851_v24  ;;  %v1906_v23 = vld [vmem:[#allocation5 + $0x380] sm:$0xff]   ;;  %v55_v24 = vld [vmem:[#allocation2 + $0x68] sm:$0xff] }
  0x63   :  { %1712 = vmatprep.subr.bf16.mxu1 %v1852_v25  ;;  %v57_v25 = vld [vmem:[#allocation2 + $0x78] sm:$0xff] }
  0x65   :  { %1691 = vmatpush3.bf16.msra.mxu0 %v1853_v26  ;;  %v54_v26 = vld [vmem:[#allocation2 + $0x60] sm:$0xff] }
  0x66   :  { %1713 = vmatpush3.bf16.msra.mxu1 %v1854_v27  ;;  %1692 = vmatprep.subr.bf16.mxu0 %v1855_v28  ;;  %v71_v27 = vpack.c.bf16 %v55_v24, %v55_v24  ;;  %v73_v28 = vpack.c.bf16 %v57_v25, %v57_v25 }
  0x67   :  { %1714 = vmatprep.subr.bf16.mxu1 %v1856_v29  ;;  %v70_v29 = vpack.c.bf16 %v54_v26, %v54_v26 }
  0x69   :  { %1693 = vmatpush3.bf16.msra.mxu0 %v1857_v30  ;;  %v56_v30 = vld [vmem:[#allocation2 + $0x70] sm:$0xff] }
  0x6a   :  { %1715 = vmatpush3.bf16.msra.mxu1 %v1858_v31  ;;  %1694 = vmatprep.subr.bf16.mxu0 %v1859_v32  ;;  %v72_v31 = vpack.c.bf16 %v56_v30, %v56_v30 }
  0x6b   :  { %1716 = vmatprep.subr.bf16.mxu1 %v1860_v33 }
  0x6d   :  { %1695 = vmatpush3.bf16.msra.mxu0 %v1861_v34 }
  0x6e   :  { %1717 = vmatpush3.bf16.msra.mxu1 %v1862_v35  ;;  %1696 = vmatprep.subr.bf16.mxu0 %v1863_v36 }
  0x6f   :  { %1718 = vmatprep.subr.bf16.mxu1 %v1864_v37 }
  0x71   :  { %1697 = vmatpush3.bf16.msra.mxu0 %v1865_v38 }
  0x72   :  { %1719 = vmatpush3.bf16.msra.mxu1 %v1866_v39  ;;  %1698 = vmatprep.subr.bf16.mxu0 %v1867_v40 }
  0x73   :  { %1720 = vmatprep.subr.bf16.mxu1 %v1868_v41 }
  0x75   :  { %1699 = vmatpush3.bf16.msra.mxu0 %v1869_v42 }
  0x76   :  { %1721 = vmatpush3.bf16.msra.mxu1 %v1870_v43  ;;  %1700 = vmatprep.subr.bf16.mxu0 %v1871_v44 }
  0x77   :  { %1722 = vmatprep.subr.bf16.mxu1 %v1872_v45 }
  0x79   :  { %1701 = vmatpush3.bf16.msra.mxu0 %v1873_v46 }
  0x7a   :  { %1723 = vmatpush3.bf16.msra.mxu1 %v1874_v47  ;;  %1730 = vmatprep.subr.bf16.mxu0 %v1875_v56 }
  0x7b   :  { %1752 = vmatprep.subr.bf16.mxu1 %v1876_v57 }
  0x7c   :  { %1291 = vmatmul.mubr.bf16.vlgmr.msra.gmra.mxu0 %v66_v54 }
  0x7d   :  { %1331 = vmatmul.mubr.bf16.vlgmr.msra.gmra.mxu1 %v68_v55  ;;  %1731 = vmatpush3.bf16.msra.mxu0 %v1877_v58 }
  0x7e   :  { %1753 = vmatpush3.bf16.msra.mxu1 %v1878_v59  ;;  %1732 = vmatprep.subr.bf16.mxu0 %v1879_v60 }
  0x7f   :  { %1754 = vmatprep.subr.bf16.mxu1 %v1880_v61  ;;  %1370 = vmatprep.mubr.bf16.mxu0 %v71_v27 }
  0x80   :  { %1410 = vmatprep.mubr.bf16.mxu1 %v73_v28 }
  0x81   :  { %1733 = vmatpush3.bf16.msra.mxu0 %v1881_v62 }
  0x82   :  { %1755 = vmatpush3.bf16.msra.mxu1 %v1882_v63  ;;  %1734 = vmatprep.subr.bf16.mxu0 %v1883_v0 }
  0x83   :  { %1756 = vmatprep.subr.bf16.mxu1 %v1884_v1 }
  0x85   :  { %1735 = vmatpush3.bf16.msra.mxu0 %v1885_v2 }
  0x86   :  { %1757 = vmatpush3.bf16.msra.mxu1 %v1886_v3  ;;  %1736 = vmatprep.subr.bf16.mxu0 %v1887_v4 }
  0x87   :  { %1758 = vmatprep.subr.bf16.mxu1 %v1888_v5 }
  0x89   :  { %1737 = vmatpush3.bf16.msra.mxu0 %v1889_v6 }
  0x8a   :  { %1759 = vmatpush3.bf16.msra.mxu1 %v1890_v7  ;;  %1738 = vmatprep.subr.bf16.mxu0 %v1891_v8 }
  0x8b   :  { %1760 = vmatprep.subr.bf16.mxu1 %v1892_v9 }
  0x8d   :  { %1739 = vmatpush3.bf16.msra.mxu0 %v1893_v10 }
  0x8e   :  { %1761 = vmatpush3.bf16.msra.mxu1 %v1894_v11  ;;  %1740 = vmatprep.subr.bf16.mxu0 %v1895_v12 }
  0x8f   :  { %1762 = vmatprep.subr.bf16.mxu1 %v1896_v13 }
  0x91   :  { %1741 = vmatpush3.bf16.msra.mxu0 %v1897_v14 }
  0x92   :  { %1763 = vmatpush3.bf16.msra.mxu1 %v1898_v15  ;;  %1742 = vmatprep.subr.bf16.mxu0 %v1899_v16 }
  0x93   :  { %1764 = vmatprep.subr.bf16.mxu1 %v1900_v17 }
  0x95   :  { %1743 = vmatpush3.bf16.msra.mxu0 %v1901_v18 }
  0x96   :  { %1765 = vmatpush3.bf16.msra.mxu1 %v1902_v19  ;;  %1744 = vmatprep.subr.bf16.mxu0 %v1903_v20 }
  0x97   :  { %1766 = vmatprep.subr.bf16.mxu1 %v1904_v21 }
  0x99   :  { %1745 = vmatpush3.bf16.msra.mxu0 %v1905_v22 }
  0x9a   :  { %1767 = vmatpush3.bf16.msra.mxu1 %v1906_v23 }
  0x9c   :  { %1371 = vmatmul.mubr.bf16.vlgmr.msra.gmra.mxu0 %v70_v29 }
  0x9d   :  { %1411 = vmatmul.mubr.bf16.vlgmr.msra.gmra.mxu1 %v72_v31 }
  0xfc   :  { %v1614_v32 = vpop.f32.mrf.mxu0 }
  0xfd   :  { %v1636_v33 = vpop.f32.mrf.mxu1 }
  0xfe   :  { %v1615_v34 = vpop.f32.mrf.mxu0 }
  0xff   :  { %v1637_v35 = vpop.f32.mrf.mxu1  ;;  %v1616_v36 = vadd.f32 %v1615_v34, %v1614_v32  ;;  %v1443_v34 = vlaneseq }
 0x100   :  { %v1638_v37 = vadd.f32 %v1637_v35, %v1636_v33  ;;  %v1617_v38 = vpop.f32.mrf.mxu0 }
 0x101   :  { %v1639_v39 = vpop.f32.mrf.mxu1  ;;  %v1444_v35 = vshrl.u32 %v1443_v34, 7 }
 0x102   :  { %v1173_v40 = vadd.f32 %v1638_v37, %v1616_v36  ;;  %v1618_v41 = vpop.f32.mrf.mxu0  ;;  %v1436_v36 = vld [vmem:[%s2017_s2] sm:$0x1] }
 0x103   :  { %v1640_v42 = vpop.f32.mrf.mxu1  ;;  %v1445_v37 = vsub.s32 0, %v1444_v35 }
 0x11c   :  { %v1658_v43 = vpop.f32.mrf.mxu0 }
 0x11d   :  { %v1680_v44 = vpop.f32.mrf.mxu1 }
 0x11e   :  { %v1659_v45 = vpop.f32.mrf.mxu0 }
 0x11f   :  { %v1681_v46 = vpop.f32.mrf.mxu1  ;;  %v1660_v59 = vadd.f32 %v1659_v45, %v1658_v43 }
 0x120   :  { %v1661_v47 = vpop.f32.mrf.mxu0  ;;  %v1682_v61 = vadd.f32 %v1681_v46, %v1680_v44 }
 0x121   :  { %v1683_v48 = vpop.f32.mrf.mxu1  ;;  %v1213_v60 = vadd.f32 %v1660_v59, %v1173_v40  ;;  %v1437_v40 = vld [vmem:[%s2017_s2 + $0x1] sm:$0x1] }
 0x122   :  { %v1662_v49 = vpop.f32.mrf.mxu0 }
 0x123   :  { %v1684_v50 = vpop.f32.mrf.mxu1  ;;  %v1253_v63 = vadd.f32 %v1682_v61, %v1213_v60 }
 0x13c   :  { %v1702_v51 = vpop.f32.mrf.mxu0 }
 0x13d   :  { %v1724_v52 = vpop.f32.mrf.mxu1 }
 0x13e   :  { %v1703_v53 = vpop.f32.mrf.mxu0 }
 0x13f   :  { %v1725_v54 = vpop.f32.mrf.mxu1  ;;  %v1704_v62 = vadd.f32 %v1703_v53, %v1702_v51 }
 0x140   :  { %v1705_v55 = vpop.f32.mrf.mxu0  ;;  %v1726_v1 = vadd.f32 %v1725_v54, %v1724_v52 }
 0x141   :  { %v1727_v56 = vpop.f32.mrf.mxu1  ;;  %v1293_v0 = vadd.f32 %v1704_v62, %v1253_v63 }
 0x142   :  { %v1706_v57 = vpop.f32.mrf.mxu0 }
 0x143   :  { %v1728_v58 = vpop.f32.mrf.mxu1  ;;  %v1333_v6 = vadd.f32 %v1726_v1, %v1293_v0 }
 0x15c   :  { %v1746_v2 = vpop.f32.mrf.mxu0 }
 0x15d   :  { %v1768_v3 = vpop.f32.mrf.mxu1 }
 0x15e   :  { %v1747_v4 = vpop.f32.mrf.mxu0 }
 0x15f   :  { %v1769_v5 = vpop.f32.mrf.mxu1  ;;  %v1748_v7 = vadd.f32 %v1747_v4, %v1746_v2 }
 0x160   :  { %v1749_v8 = vpop.f32.mrf.mxu0  ;;  %v1770_v11 = vadd.f32 %v1769_v5, %v1768_v3 }
 0x161   :  { %v1771_v9 = vpop.f32.mrf.mxu1  ;;  %v1373_v10 = vadd.f32 %v1748_v7, %v1333_v6 }
 0x162   :  { %v1750_v12 = vpop.f32.mrf.mxu0 }
 0x163   :  { %v1772_v13 = vpop.f32.mrf.mxu1  ;;  %v1413_v14 = vadd.f32 %v1770_v11, %v1373_v10 }
 0x165   :  { %v1418_v15 = vrot.slane %v1413_v14, 4  ;;  %v1425_v16 = vmul.f32 %v1413_v14, %v1413_v14 }
 0x167   :  { %v1419_v17 = vadd.f32 %v1418_v15, %v1413_v14  ;;  %v1426_v18 = vrot.slane %v1425_v16, 4 }
 0x169   :  { %v1420_v19 = vrot.slane %v1419_v17, 2  ;;  %v1427_v20 = vadd.f32 %v1426_v18, %v1425_v16 }
 0x16b   :  { %v1421_v21 = vadd.f32 %v1420_v19, %v1419_v17  ;;  %v1428_v22 = vrot.slane %v1427_v20, 2 }
 0x16d   :  { %v1429_v23 = vadd.f32 %v1428_v22, %v1427_v20  ;;  %v1422_v24 = vrot.slane %v1421_v21, 1 }
 0x16f   :  { %v1430_v25 = vrot.slane %v1429_v23, 1  ;;  %v1423_v26 = vadd.f32 %v1422_v24, %v1421_v21 }
 0x171   :  { %v1431_v27 = vadd.f32 %v1430_v25, %v1429_v23  ;;  %v1424_v28 = vmul.f32 0.125, %v1423_v26 }
 0x173   :  { %v1432_v29 = vmul.f32 0.125, %v1431_v27  ;;  %v1433_v30 = vmul.f32 %v1424_v28, %v1424_v28 }
 0x175   :  { %v1434_v31 = vsub.f32 %v1432_v29, %v1433_v30 }
 0x177   :  { %v1435_v32 = vmax.f32 %v1434_v31, 0.0 }
 0x179   :  { %v1438_v33 = vadd.f32 1e-05, %v1435_v32 }
 0x17b   :  { %1907 = vrsqrt.f32 %v1438_v33 }
 0x188   :  { %v1908_v38 = vpop.eup %1907 }
 0x189   :  { %v1440_v39 = vmul.f32 %v1908_v38, %v1436_v36 }
 0x18b   :  { %v1441_v41 = vmul.f32 %v1440_v39, %v1424_v28  ;;  %v1446_v42 = vrot.slane %v1440_v39, %v1445_v37 }
 0x18d   :  { %v1442_v43 = vsub.f32 %v1437_v40, %v1441_v41  ;;  %v1447_v44 = vmul.f32 %v1446_v42, %v1413_v14 }
 0x18f   :  { %v1451_v45 = vrot.slane %v1442_v43, %v1445_v37 }
 0x191   :  { %v1452_v46 = vadd.f32 %v1451_v45, %v1447_v44 }
 0x193   :  { %1453 = vst [vmem:[#allocation7] sm:$0xff] %v1452_v46 }
 0x194   :  { %1960 = shalt.err (!%p1957_p0)
}
 0x195   :  { %1463 = dma.vmem_to_hbm [thread:$0]  %s1461_s27, 128, %s2018_s3, [#allocation4]  }
 0x196   :  { %1973 = dma.done.wait [#allocation4], 128  }
 0x197   :  { %1974 = vsyncadd [#allocation4], 4294967168 }
 0x198   :  { %1467 = vsyncpa [#allocation3], 1 }
 0x199   :  { %1468 = vsyncpa [#allocation6], 1 }
 0x19a   :  { %1469 = vsyncpa [#allocation4], 1 }

</bundles_post_ra>
